<compile_context>
chip_gen: v6e
topology: v6e:2x2x1
jax: 0.10.0
libtpu: 0.0.40
codegen_flags: <defaults>
</compile_context>

<pallas_src>
import functools
import math

import jax
import jax.numpy as jnp
from jax.experimental import pallas as pl
from jax.experimental.pallas import tpu as pltpu


# ----------------------------------------------------------------------------
# Fused FeedForward kernel: one (TILE_M, d_model) row tile per grid step.
# ----------------------------------------------------------------------------
def _feed_forward_kernel(x_ref, w1_ref, b1_ref, w2_ref, b2_ref, g_ref, bt_ref,
                         o_ref, *, eps):
    x = x_ref[...]                                   # (TILE_M, D), native dtype

    # linear1 (bf16 MXU, f32 accumulate) + bias + ReLU -- stays in vregs.
    h = jnp.maximum(
        jnp.dot(x.astype(jnp.bfloat16), w1_ref[...],
                preferred_element_type=jnp.float32) + b1_ref[...],
        0.0)

    # linear2 (bf16 MXU, f32 accumulate) + bias + residual (f32).
    y = (jnp.dot(h.astype(jnp.bfloat16), w2_ref[...],
                 preferred_element_type=jnp.float32)
         + b2_ref[...] + x.astype(jnp.float32))

    # LayerNorm over d_model (PyTorch semantics), one-pass statistics.
    mu = jnp.mean(y, axis=-1, keepdims=True)
    var = jnp.maximum(jnp.mean(y * y, axis=-1, keepdims=True) - mu * mu, 0.0)
    o_ref[...] = ((y - mu) * jax.lax.rsqrt(var + eps) * g_ref[...]
                  + bt_ref[...]).astype(o_ref.dtype)


# ----------------------------------------------------------------------------
# Tile / VMEM-budget helpers
# ----------------------------------------------------------------------------
def _choose_tile_m(M, cap, row_align):
    """Largest row tile <= cap that avoids pad/slice copies when possible."""
    if M <= cap:
        return M, M                      # block == full dim -> always legal
    t = (cap // row_align) * row_align
    while t >= row_align:
        if M % t == 0:
            return t, M                  # exact divisor, no padding needed
        t -= row_align
    Mp = pl.cdiv(M, cap) * cap           # fallback: pad rows up (sliced off)
    return cap, Mp


def _vmem_budget_bytes(tile_m, d_model, d_ff, x_itemsize, out_itemsize):
    resident = 2 * d_model * d_ff * 2                      # W1 + W2 (bf16)
    resident += (d_ff + 3 * d_model) * 4                   # b1, b2, gamma, beta
    streamed = 2 * tile_m * d_model * (x_itemsize + out_itemsize)  # dbl-buffered
    est = resident + streamed
    # 3x headroom for compiler scratch, clamped inside v7x's 64 MiB physical.
    return int(min(max(3 * est + (2 << 20), 16 << 20), 48 << 20))


# ----------------------------------------------------------------------------
# Wrapper
# ----------------------------------------------------------------------------
def feed_forward(x, params, *, tile_m=256, eps=1e-5):
    """Fused FeedForward forward pass.  x: (..., d_model)."""
    lead = x.shape[:-1]
    d_model = x.shape[-1]
    d_ff = params["w1"].shape[-1]
    M = int(math.prod(lead)) if lead else 1

    x2 = x.reshape(M, d_model)
    row_align = 16 if x2.dtype == jnp.bfloat16 else 8
    tm, Mp = _choose_tile_m(M, tile_m, row_align)
    if Mp != M:
        x2 = jnp.pad(x2, ((0, Mp - M), (0, 0)))

    w1 = params["w1"].astype(jnp.bfloat16)               # resident in VMEM
    w2 = params["w2"].astype(jnp.bfloat16)               # resident in VMEM
    b1 = params["b1"].reshape(1, d_ff).astype(jnp.float32)
    b2 = params["b2"].reshape(1, d_model).astype(jnp.float32)
    g = params["gamma"].reshape(1, d_model).astype(jnp.float32)
    bt = params["beta"].reshape(1, d_model).astype(jnp.float32)

    out_dtype = x.dtype
    vmem_bytes = _vmem_budget_bytes(tm, d_model, d_ff,
                                    jnp.dtype(x2.dtype).itemsize,
                                    jnp.dtype(out_dtype).itemsize)

    out = pl.pallas_call(
        functools.partial(_feed_forward_kernel, eps=eps),
        out_shape=jax.ShapeDtypeStruct((Mp, d_model), out_dtype),
        grid=(Mp // tm,),
        in_specs=[
            pl.BlockSpec((tm, d_model), lambda i: (i, 0)),    # x row tile
            pl.BlockSpec((d_model, d_ff), lambda i: (0, 0)),  # W1 (resident)
            pl.BlockSpec((1, d_ff), lambda i: (0, 0)),        # b1
            pl.BlockSpec((d_ff, d_model), lambda i: (0, 0)),  # W2 (resident)
            pl.BlockSpec((1, d_model), lambda i: (0, 0)),     # b2
            pl.BlockSpec((1, d_model), lambda i: (0, 0)),     # gamma
            pl.BlockSpec((1, d_model), lambda i: (0, 0)),     # beta
        ],
        out_specs=pl.BlockSpec((tm, d_model), lambda i: (i, 0)),
        compiler_params=pltpu.CompilerParams(
            dimension_semantics=("parallel",),
            vmem_limit_bytes=vmem_bytes),
    )(x2, w1, b1, w2, b2, g, bt)

    if Mp != M:
        out = out[:M]
    return out.reshape(lead + (d_model,))


# ----------------------------------------------------------------------------
# Pure-JAX reference (f32) for correctness checking
# ----------------------------------------------------------------------------
def feed_forward_ref(x, params, eps=1e-5):
    h = jnp.maximum(x @ params["w1"] + params["b1"], 0.0)
    y = h @ params["w2"] + params["b2"] + x
    mu = jnp.mean(y, axis=-1, keepdims=True)
    var = jnp.mean(jnp.square(y - mu), axis=-1, keepdims=True)
    return (y - mu) * jax.lax.rsqrt(var + eps) * params["gamma"] + params["beta"]


# ----------------------------------------------------------------------------
# Parameter init (PyTorch nn.Linear default: U(-1/sqrt(fan_in), 1/sqrt(fan_in)))
# Weights stored (in, out); PyTorch stores (out, in) -- transpose to load.
# ----------------------------------------------------------------------------
def init_params(key, d_model, d_ff):
    k1, k2, k3, k4 = jax.random.split(key, 4)
    lim1 = 1.0 / math.sqrt(d_model)
    lim2 = 1.0 / math.sqrt(d_ff)
    return {
        "w1": jax.random.uniform(k1, (d_model, d_ff), jnp.float32, -lim1, lim1),
        "b1": jax.random.uniform(k2, (d_ff,), jnp.float32, -lim1, lim1),
        "w2": jax.random.uniform(k3, (d_ff, d_model), jnp.float32, -lim2, lim2),
        "b2": jax.random.uniform(k4, (d_model,), jnp.float32, -lim2, lim2),
        "gamma": jnp.ones((d_model,), jnp.float32),
        "beta": jnp.zeros((d_model,), jnp.float32),
    }


# ----------------------------------------------------------------------------
if __name__ == "__main__":
    d_model, d_ff = 128, 256          # lane-dense (multiple of 128)
    B, P, N = 2, 8, 8                 # leading dims -> M = 128 rows

    root = jax.random.PRNGKey(0)
    kp, kx = jax.random.split(root)

    params = init_params(kp, d_model, d_ff)
    x = jax.random.normal(kx, (B, P, N, d_model), jnp.float32)

    ff = jax.jit(functools.partial(feed_forward, tile_m=256))
    out = jax.block_until_ready(ff(x, params))

    ref = jax.block_until_ready(feed_forward_ref(x, params))

    assert out.shape == (B, P, N, d_model), out.shape
    assert out.dtype == x.dtype, out.dtype
    max_err = float(jnp.max(jnp.abs(out.astype(jnp.float32) - ref)))
    # bf16 MXU inputs with f32 accumulation -> small, bounded mismatch vs f32.
    assert max_err < 4e-2, f"mismatch vs reference: {max_err}"
    print("KERNEL_OK")
</pallas_src>

<mosaic_0001>
module attributes {stable_mosaic.version = 11 : i64} {
  func.func @_feed_forward_kernel(%arg0: i32, %arg1: memref<128x128xf32, #tpu.memory_space<vmem>>, %arg2: memref<128x256xbf16, #tpu.memory_space<vmem>>, %arg3: memref<1x256xf32, #tpu.memory_space<vmem>>, %arg4: memref<256x128xbf16, #tpu.memory_space<vmem>>, %arg5: memref<1x128xf32, #tpu.memory_space<vmem>>, %arg6: memref<1x128xf32, #tpu.memory_space<vmem>>, %arg7: memref<1x128xf32, #tpu.memory_space<vmem>>, %arg8: memref<128x128xf32, #tpu.memory_space<vmem>>) attributes {dimension_semantics = [#tpu.dimension_semantics<parallel>], iteration_bounds = array<i64: 1>, scalar_prefetch = 0 : i64, scratch_operands = 0 : i64, tpu.core_type = #tpu.core_type<tc>, window_params = [{transform_indices = @transform_0, window_bounds = array<i64: 128, 128>}, {pipeline_mode = #tpu.pipeline_mode<synchronous>, transform_indices = @transform_1, window_bounds = array<i64: 128, 256>}, {pipeline_mode = #tpu.pipeline_mode<synchronous>, transform_indices = @transform_2, window_bounds = array<i64: 1, 256>}, {pipeline_mode = #tpu.pipeline_mode<synchronous>, transform_indices = @transform_3, window_bounds = array<i64: 256, 128>}, {pipeline_mode = #tpu.pipeline_mode<synchronous>, transform_indices = @transform_4, window_bounds = array<i64: 1, 128>}, {pipeline_mode = #tpu.pipeline_mode<synchronous>, transform_indices = @transform_5, window_bounds = array<i64: 1, 128>}, {pipeline_mode = #tpu.pipeline_mode<synchronous>, transform_indices = @transform_6, window_bounds = array<i64: 1, 128>}, {transform_indices = @transform_7, window_bounds = array<i64: 128, 128>}]} {
    %c0 = arith.constant 0 : index
    %c0_0 = arith.constant 0 : index
    %0 = vector.load %arg1[%c0, %c0_0] : memref<128x128xf32, #tpu.memory_space<vmem>>, vector<128x128xf32>
    %1 = arith.truncf %0 : vector<128x128xf32> to vector<128x128xbf16>
    %c0_1 = arith.constant 0 : index
    %c0_2 = arith.constant 0 : index
    %2 = vector.load %arg2[%c0_1, %c0_2] : memref<128x256xbf16, #tpu.memory_space<vmem>>, vector<128x256xbf16>
    %cst = arith.constant dense<0.000000e+00> : vector<128x256xf32>
    %3 = tpu.matmul %1, %2, %cst {dimension_numbers = #tpu.dot_dimension_numbers<[1], [0], [0], [1], [0, 0, 1, 1], [], []>} : vector<128x128xbf16>, vector<128x256xbf16>, vector<128x256xf32> -> vector<128x256xf32>
    %c0_3 = arith.constant 0 : index
    %c0_4 = arith.constant 0 : index
    %4 = vector.load %arg3[%c0_3, %c0_4] : memref<1x256xf32, #tpu.memory_space<vmem>>, vector<1x256xf32>
    %5 = vector.broadcast %4 : vector<1x256xf32> to vector<128x256xf32>
    %6 = arith.addf %3, %5 : vector<128x256xf32>
    %cst_5 = arith.constant 0.000000e+00 : f32
    %7 = vector.broadcast %cst_5 : f32 to vector<128x256xf32>
    %8 = arith.maximumf %6, %7 : vector<128x256xf32>
    %9 = arith.truncf %8 : vector<128x256xf32> to vector<128x256xbf16>
    %c0_6 = arith.constant 0 : index
    %c0_7 = arith.constant 0 : index
    %10 = vector.load %arg4[%c0_6, %c0_7] : memref<256x128xbf16, #tpu.memory_space<vmem>>, vector<256x128xbf16>
    %cst_8 = arith.constant dense<0.000000e+00> : vector<128x128xf32>
    %11 = tpu.matmul %9, %10, %cst_8 {dimension_numbers = #tpu.dot_dimension_numbers<[1], [0], [0], [1], [0, 0, 1, 1], [], []>} : vector<128x256xbf16>, vector<256x128xbf16>, vector<128x128xf32> -> vector<128x128xf32>
    %c0_9 = arith.constant 0 : index
    %c0_10 = arith.constant 0 : index
    %12 = vector.load %arg5[%c0_9, %c0_10] : memref<1x128xf32, #tpu.memory_space<vmem>>, vector<1x128xf32>
    %13 = vector.broadcast %12 : vector<1x128xf32> to vector<128x128xf32>
    %14 = arith.addf %11, %13 : vector<128x128xf32>
    %15 = arith.addf %14, %0 : vector<128x128xf32>
    %cst_11 = arith.constant dense<0.000000e+00> : vector<128xf32>
    %16 = vector.multi_reduction <add>, %15, %cst_11 [1] : vector<128x128xf32> to vector<128xf32>
    %17 = vector.shape_cast %16 : vector<128xf32> to vector<128x1xf32>
    %cst_12 = arith.constant 1.280000e+02 : f32
    %18 = vector.broadcast %cst_12 : f32 to vector<128x1xf32>
    %19 = arith.divf %17, %18 : vector<128x1xf32>
    %20 = arith.mulf %15, %15 : vector<128x128xf32>
    %cst_13 = arith.constant dense<0.000000e+00> : vector<128xf32>
    %21 = vector.multi_reduction <add>, %20, %cst_13 [1] : vector<128x128xf32> to vector<128xf32>
    %22 = vector.shape_cast %21 : vector<128xf32> to vector<128x1xf32>
    %cst_14 = arith.constant 1.280000e+02 : f32
    %23 = vector.broadcast %cst_14 : f32 to vector<128x1xf32>
    %24 = arith.divf %22, %23 : vector<128x1xf32>
    %25 = arith.mulf %19, %19 : vector<128x1xf32>
    %26 = arith.subf %24, %25 : vector<128x1xf32>
    %cst_15 = arith.constant 0.000000e+00 : f32
    %27 = vector.broadcast %cst_15 : f32 to vector<128x1xf32>
    %28 = arith.maximumf %26, %27 : vector<128x1xf32>
    %29 = vector.broadcast %19 : vector<128x1xf32> to vector<128x128xf32>
    %30 = arith.subf %15, %29 : vector<128x128xf32>
    %cst_16 = arith.constant 9.99999974E-6 : f32
    %31 = vector.broadcast %cst_16 : f32 to vector<128x1xf32>
    %32 = arith.addf %28, %31 : vector<128x1xf32>
    %33 = math.rsqrt %32 : vector<128x1xf32>
    %34 = vector.broadcast %33 : vector<128x1xf32> to vector<128x128xf32>
    %35 = arith.mulf %30, %34 : vector<128x128xf32>
    %c0_17 = arith.constant 0 : index
    %c0_18 = arith.constant 0 : index
    %36 = vector.load %arg6[%c0_17, %c0_18] : memref<1x128xf32, #tpu.memory_space<vmem>>, vector<1x128xf32>
    %37 = vector.broadcast %36 : vector<1x128xf32> to vector<128x128xf32>
    %38 = arith.mulf %35, %37 : vector<128x128xf32>
    %c0_19 = arith.constant 0 : index
    %c0_20 = arith.constant 0 : index
    %39 = vector.load %arg7[%c0_19, %c0_20] : memref<1x128xf32, #tpu.memory_space<vmem>>, vector<1x128xf32>
    %40 = vector.broadcast %39 : vector<1x128xf32> to vector<128x128xf32>
    %41 = arith.addf %38, %40 : vector<128x128xf32>
    %c0_21 = arith.constant 0 : index
    %c0_22 = arith.constant 0 : index
    %42 = vector.load %arg8[%c0_21, %c0_22] : memref<128x128xf32, #tpu.memory_space<vmem>>, vector<128x128xf32>
    tpu.vector_store %arg8[%c0_21, %c0_22], %41 {strides = array<i32>} : memref<128x128xf32, #tpu.memory_space<vmem>>, vector<128x128xf32>,
    return
  }
  func.func @transform_0(%arg0: i32) -> (i32, i32) {
    %c0_i32 = arith.constant 0 : i32
    %c0_i32_0 = arith.constant 0 : i32
    return %arg0, %c0_i32 : i32, i32
  }
  func.func @transform_1(%arg0: i32) -> (i32, i32) {
    %c0_i32 = arith.constant 0 : i32
    %c0_i32_0 = arith.constant 0 : i32
    %c0_i32_1 = arith.constant 0 : i32
    return %c0_i32, %c0_i32_0 : i32, i32
  }
  func.func @transform_2(%arg0: i32) -> (i32, i32) {
    %c0_i32 = arith.constant 0 : i32
    %c0_i32_0 = arith.constant 0 : i32
    %c0_i32_1 = arith.constant 0 : i32
    return %c0_i32, %c0_i32_0 : i32, i32
  }
  func.func @transform_3(%arg0: i32) -> (i32, i32) {
    %c0_i32 = arith.constant 0 : i32
    %c0_i32_0 = arith.constant 0 : i32
    %c0_i32_1 = arith.constant 0 : i32
    return %c0_i32, %c0_i32_0 : i32, i32
  }
  func.func @transform_4(%arg0: i32) -> (i32, i32) {
    %c0_i32 = arith.constant 0 : i32
    %c0_i32_0 = arith.constant 0 : i32
    %c0_i32_1 = arith.constant 0 : i32
    return %c0_i32, %c0_i32_0 : i32, i32
  }
  func.func @transform_5(%arg0: i32) -> (i32, i32) {
    %c0_i32 = arith.constant 0 : i32
    %c0_i32_0 = arith.constant 0 : i32
    %c0_i32_1 = arith.constant 0 : i32
    return %c0_i32, %c0_i32_0 : i32, i32
  }
  func.func @transform_6(%arg0: i32) -> (i32, i32) {
    %c0_i32 = arith.constant 0 : i32
    %c0_i32_0 = arith.constant 0 : i32
    %c0_i32_1 = arith.constant 0 : i32
    return %c0_i32, %c0_i32_0 : i32, i32
  }
  func.func @transform_7(%arg0: i32) -> (i32, i32) {
    %c0_i32 = arith.constant 0 : i32
    %c0_i32_0 = arith.constant 0 : i32
    return %arg0, %c0_i32 : i32, i32
  }
}

</mosaic_0001>

<bundles_post_ra>
// kernel: feed_forward.1
= control target key start
LH: loop header
LB: loop body
LE: loop exit
PB: predicated region body
PF: predicated region fallthrough
CT: control target
= control target key end

     0   :  { %v1069_v2 = vmov 0   ;;  %s1600_s0 = inlined_call_operand.vmem [shape: f32[128,128], index: 0, kind: input, shape index: {}]   ;;  %s1601_s1 = inlined_call_operand.vmem [shape: bf16[128,256], index: 1, kind: input, shape index: {}]   ;;  %s1602_s2 = inlined_call_operand.vmem [shape: f32[1,256], index: 2, kind: input, shape index: {}]   ;;  %s1603_s3 = inlined_call_operand.vmem [shape: bf16[256,128], index: 3, kind: input, shape index: {}]   ;;  %s1604_s4 = inlined_call_operand.vmem [shape: f32[1,128], index: 4, kind: input, shape index: {}]   ;;  %s1605_s5 = inlined_call_operand.vmem [shape: f32[1,128], index: 5, kind: input, shape index: {}]   ;;  %s1606_s6 = inlined_call_operand.vmem [shape: f32[1,128], index: 6, kind: input, shape index: {}]   ;;  %s1607_s7 = inlined_call_operand.hbm [shape: f32[128,128], index: 7, kind: output, shape index: {}]  }
   0x1   :  { %v975_v0 = vld [vmem:[%s1601_s1 + $0x74] ss:$8 sps:$4 sm:$0xff]   ;;  %v977_v1 = vld [vmem:[%s1601_s1 + $0x70] ss:$8 sps:$4 sm:$0xff]   ;;  %192 = vmatprep.mubr.bf16.mxu0 %v1069_v2  ;;  %v978_v3 = vld [vmem:[%s1601_s1 + $0x64] ss:$8 sps:$4 sm:$0xff]  }
   0x2   :  { %160 = vmatprep.subr.bf16.mxu0 %v975_v0  ;;  %v980_v4 = vld [vmem:[%s1601_s1 + $0x60] ss:$8 sps:$4 sm:$0xff]   ;;  %v981_v5 = vld [vmem:[%s1601_s1 + $0x54] ss:$8 sps:$4 sm:$0xff]   ;;  %v983_v6 = vld [vmem:[%s1601_s1 + $0x50] ss:$8 sps:$4 sm:$0xff]  }
   0x3   :  { %161 = vmatpush1.bf16.msra.mxu0 %v977_v1  ;;  %v984_v7 = vld [vmem:[%s1601_s1 + $0x44] ss:$8 sps:$4 sm:$0xff]   ;;  %v986_v8 = vld [vmem:[%s1601_s1 + $0x40] ss:$8 sps:$4 sm:$0xff]   ;;  %v987_v9 = vld [vmem:[%s1601_s1 + $0x34] ss:$8 sps:$4 sm:$0xff]  }
   0x4   :  { %162 = vmatprep.subr.bf16.mxu0 %v978_v3  ;;  %v989_v10 = vld [vmem:[%s1601_s1 + $0x30] ss:$8 sps:$4 sm:$0xff]   ;;  %v990_v11 = vld [vmem:[%s1601_s1 + $0x24] ss:$8 sps:$4 sm:$0xff]   ;;  %v992_v13 = vld [vmem:[%s1601_s1 + $0x20] ss:$8 sps:$4 sm:$0xff]  }
   0x5   :  { %v999_v12 = vld [vmem:[%s1603_s3 + $0x78] sm:$0xff]   ;;  %v1001_v16 = vld [vmem:[%s1603_s3 + $0x70] sm:$0xff]   ;;  %v1003_v18 = vld [vmem:[%s1603_s3 + $0x68] sm:$0xff]  }
   0x6   :  { %v1000_v14 = vld [vmem:[%s1603_s3 + $0x38] sm:$0xff]   ;;  %907 = vmatprep.subr.bf16.mxu1 %v999_v12  ;;  %v1002_v17 = vld [vmem:[%s1603_s3 + $0x30] sm:$0xff]   ;;  %v996_v20 = vld [vmem:[%s1601_s1 + $0x4] ss:$8 sps:$4 sm:$0xff]  }
   0x7   :  { %163 = vmatpush1.bf16.msra.mxu0 %v980_v4  ;;  %v993_v15 = vld [vmem:[%s1601_s1 + $0x14] ss:$8 sps:$4 sm:$0xff]   ;;  %908 = vmatpush3.bf16.msra.mxu1 %v1000_v14  ;;  %v995_v19 = vld [vmem:[%s1601_s1 + $0x10] ss:$8 sps:$4 sm:$0xff]   ;;  %v1004_v21 = vld [vmem:[%s1603_s3 + $0x28] sm:$0xff]  }
   0x8   :  { %164 = vmatprep.subr.bf16.mxu0 %v981_v5  ;;  %909 = vmatprep.subr.bf16.mxu1 %v1001_v16  ;;  %v1005_v22 = vld [vmem:[%s1603_s3 + $0x60] sm:$0xff]   ;;  %v1191_v25 = vld [vmem:[%s1600_s0 + $0x8] sm:$0xff]  ;;  %v1007_v27 = vld [vmem:[%s1603_s3 + $0x58] sm:$0xff]  }
   0x9   :  { %v998_v23 = vld [vmem:[%s1601_s1] ss:$8 sps:$4 sm:$0xff]  }
   0xa   :  { %v1186_v24 = vld [vmem:[%s1600_s0] sm:$0xff] }
   0xb   :  { %165 = vmatpush1.bf16.msra.mxu0 %v983_v6  ;;  %910 = vmatpush3.bf16.msra.mxu1 %v1002_v17  ;;  %v1006_v26 = vld [vmem:[%s1603_s3 + $0x20] sm:$0xff]   ;;  %v44_v28 = vpack.c.bf16 %v1191_v25, %v1186_v24 }
   0xc   :  { %166 = vmatprep.subr.bf16.mxu0 %v984_v7  ;;  %911 = vmatprep.subr.bf16.mxu1 %v1003_v18 }
   0xf   :  { %167 = vmatpush1.bf16.msra.mxu0 %v986_v8  ;;  %912 = vmatpush3.bf16.msra.mxu1 %v1004_v21 }
  0x10   :  { %168 = vmatprep.subr.bf16.mxu0 %v987_v9  ;;  %913 = vmatprep.subr.bf16.mxu1 %v1005_v22 }
  0x13   :  { %169 = vmatpush1.bf16.msra.mxu0 %v989_v10 }
  0x14   :  { %170 = vmatprep.subr.bf16.mxu0 %v990_v11 }
  0x17   :  { %171 = vmatpush1.bf16.msra.mxu0 %v992_v13 }
  0x18   :  { %172 = vmatprep.subr.bf16.mxu0 %v993_v15 }
  0x1b   :  { %173 = vmatpush1.bf16.msra.mxu0 %v995_v19 }
  0x1c   :  { %174 = vmatprep.subr.bf16.mxu0 %v996_v20 }
  0x1d   :  { %12 = vsyncpa [#allocation3], 0  ;;  %914 = vmatpush3.bf16.msra.mxu1 %v1006_v26  ;;  %v1008_v29 = vld [vmem:[%s1603_s3 + $0x18] sm:$0xff]   ;;  %v1208_v30 = vld [vmem:[%s1600_s0 + $0x10] sm:$0xff]  ;;  %v70_v57 = vlaneseq }
  0x1e   :  { %915 = vmatprep.subr.bf16.mxu1 %v1007_v27  ;;  %v1213_v31 = vld [vmem:[%s1600_s0 + $0x18] sm:$0xff]  ;;  %v1221_v33 = vld [vmem:[%s1600_s0 + $0x20] sm:$0xff]  ;;  %v1226_v34 = vld [vmem:[%s1600_s0 + $0x28] sm:$0xff] }
  0x1f   :  { %175 = vmatpush1.bf16.msra.mxu0 %v998_v23  ;;  %v45_v32 = vpack.c.bf16 %v1213_v31, %v1208_v30  ;;  %v46_v35 = vpack.c.bf16 %v1226_v34, %v1221_v33  ;;  %v1234_v36 = vld [vmem:[%s1600_s0 + $0x30] sm:$0xff]  ;;  %v1239_v37 = vld [vmem:[%s1600_s0 + $0x38] sm:$0xff]  ;;  %v1247_v39 = vld [vmem:[%s1600_s0 + $0x40] sm:$0xff]  ;;  %v71_v58 = vshrl.u32 %v70_v57, 7 }
  0x20   :  { %v47_v38 = vpack.c.bf16 %v1239_v37, %v1234_v36  ;;  %v1252_v40 = vld [vmem:[%s1600_s0 + $0x48] sm:$0xff]  ;;  %v1260_v42 = vld [vmem:[%s1600_s0 + $0x50] sm:$0xff]  ;;  %v1265_v43 = vld [vmem:[%s1600_s0 + $0x58] sm:$0xff] }
  0x21   :  { %916 = vmatpush3.bf16.msra.mxu1 %v1008_v29  ;;  %v48_v41 = vpack.c.bf16 %v1252_v40, %v1247_v39  ;;  %v49_v44 = vpack.c.bf16 %v1265_v43, %v1260_v42  ;;  %v1273_v45 = vld [vmem:[%s1600_s0 + $0x60] sm:$0xff]  ;;  %v1278_v46 = vld [vmem:[%s1600_s0 + $0x68] sm:$0xff]  ;;  %v1286_v48 = vld [vmem:[%s1600_s0 + $0x70] sm:$0xff]  ;;  %v76_v59 = vsub.s32 1, %v71_v58  ;;  %v72_v60 = vsub.s32 0, %v71_v58 }
  0x22   :  { %193 = vmatmul.mubr.bf16.vlgmr.msra.gmra.mxu0 %v44_v28  ;;  %v50_v47 = vpack.c.bf16 %v1278_v46, %v1273_v45  ;;  %v1291_v49 = vld [vmem:[%s1600_s0 + $0x78] sm:$0xff]  ;;  %v1009_v51 = vld [vmem:[%s1603_s3 + $0x50] sm:$0xff]   ;;  %v1011_v53 = vld [vmem:[%s1603_s3 + $0x48] sm:$0xff]  }
  0x23   :  { %202 = vmatprep.mubr.bf16.mxu0 %v1069_v2  ;;  %v51_v50 = vpack.c.bf16 %v1291_v49, %v1286_v48  ;;  %v1010_v52 = vld [vmem:[%s1603_s3 + $0x10] sm:$0xff]   ;;  %917 = vmatprep.subr.bf16.mxu1 %v1009_v51  ;;  %v1012_v54 = vld [vmem:[%s1603_s3 + $0x8] sm:$0xff]   ;;  %v1013_v55 = vld [vmem:[%s1603_s3 + $0x40] sm:$0xff]  }
  0x24   :  { %v1014_v56 = vld [vmem:[%s1603_s3] sm:$0xff]  }
  0x25   :  { %918 = vmatpush3.bf16.msra.mxu1 %v1010_v52  ;;  %v68_v61 = vld [vmem:[%s1602_s2] sm:$0x3] }
  0x26   :  { %919 = vmatprep.subr.bf16.mxu1 %v1011_v53  ;;  %v1316_v63 = vrot.slane %v68_v61, %v76_v59  ;;  %v1318_v0 = vrot.slane %v68_v61, %v72_v60 }
  0x29   :  { %920 = vmatpush3.bf16.msra.mxu1 %v1012_v54 }
  0x2a   :  { %203 = vmatmul.mubr.bf16.gmra.mxu0 %v45_v32  ;;  %921 = vmatprep.subr.bf16.mxu1 %v1013_v55 }
  0x2b   :  { %212 = vmatprep.mubr.bf16.mxu0 %v1069_v2 }
  0x2d   :  { %922 = vmatpush3.bf16.msra.mxu1 %v1014_v56 }
  0x32   :  { %213 = vmatmul.mubr.bf16.gmra.mxu0 %v46_v35 }
  0x33   :  { %222 = vmatprep.mubr.bf16.mxu0 %v1069_v2 }
  0x3a   :  { %223 = vmatmul.mubr.bf16.gmra.mxu0 %v47_v38 }
  0x3b   :  { %232 = vmatprep.mubr.bf16.mxu0 %v1069_v2 }
  0x42   :  { %233 = vmatmul.mubr.bf16.gmra.mxu0 %v48_v41 }
  0x43   :  { %242 = vmatprep.mubr.bf16.mxu0 %v1069_v2 }
  0x4a   :  { %243 = vmatmul.mubr.bf16.gmra.mxu0 %v49_v44 }
  0x4b   :  { %252 = vmatprep.mubr.bf16.mxu0 %v1069_v2 }
  0x52   :  { %253 = vmatmul.mubr.bf16.gmra.mxu0 %v50_v47 }
  0x53   :  { %262 = vmatprep.mubr.bf16.mxu0 %v1069_v2 }
  0x5a   :  { %263 = vmatmul.mubr.bf16.gmra.mxu0 %v51_v50 }
  0xe2   :  { %v194_v62 = vpop.f32.mrf.mxu0 }
  0xe3   :  { %v195_v5 = vadd.f32 %v194_v62, %v1318_v0 }
  0xe4   :  { %v196_v1 = vpop.f32.mrf.mxu0 }
  0xe5   :  { %v197_v3 = vadd.f32 %v196_v1, %v1316_v63  ;;  %v273_v12 = vmax.f32 %v195_v5, 0.0 }
  0xe6   :  { %v198_v2 = vpop.f32.mrf.mxu0 }
  0xe7   :  { %v199_v4 = vadd.f32 %v198_v2, %v1318_v0  ;;  %v274_v10 = vmax.f32 %v197_v3, 0.0 }
  0xe8   :  { %v200_v6 = vpop.f32.mrf.mxu0 }
  0xe9   :  { %v201_v7 = vadd.f32 %v200_v6, %v1316_v63  ;;  %v275_v8 = vmax.f32 %v199_v4, 0.0 }
  0xea   :  { %v204_v9 = vpop.f32.mrf.mxu0 }
  0xeb   :  { %v276_v11 = vmax.f32 %v201_v7, 0.0  ;;  %v305_v15 = vpack.c.bf16 %v275_v8, %v273_v12  ;;  %v205_v19 = vadd.f32 %v204_v9, %v1318_v0 }
  0xec   :  { %v206_v13 = vpop.f32.mrf.mxu0 }
  0xed   :  { %v306_v14 = vpack.c.bf16 %v276_v11, %v274_v10  ;;  %v207_v17 = vadd.f32 %v206_v13, %v1316_v63  ;;  %v277_v28 = vmax.f32 %v205_v19, 0.0 }
  0xee   :  { %v208_v16 = vpop.f32.mrf.mxu0 }
  0xef   :  { %v209_v18 = vadd.f32 %v208_v16, %v1318_v0  ;;  %488 = vmatprep.mubr.bf16.mxu1 %v306_v14  ;;  %v278_v26 = vmax.f32 %v207_v17, 0.0 }
  0xf0   :  { %v210_v20 = vpop.f32.mrf.mxu0  ;;  %489 = vmatmul.mubr.bf16.vlgmr.msra.gmra.mxu1 %v305_v15 }
  0xf1   :  { %v211_v21 = vadd.f32 %v210_v20, %v1316_v63  ;;  %v279_v22 = vmax.f32 %v209_v18, 0.0 }
  0xf2   :  { %v214_v23 = vpop.f32.mrf.mxu0 }
  0xf3   :  { %v280_v27 = vmax.f32 %v211_v21, 0.0  ;;  %v307_v35 = vpack.c.bf16 %v279_v22, %v277_v28  ;;  %v215_v47 = vadd.f32 %v214_v23, %v1318_v0 }
  0xf4   :  { %v216_v29 = vpop.f32.mrf.mxu0 }
  0xf5   :  { %v308_v32 = vpack.c.bf16 %v280_v27, %v278_v26  ;;  %v217_v41 = vadd.f32 %v216_v29, %v1316_v63  ;;  %v281_v56 = vmax.f32 %v215_v47, 0.0 }
  0xf6   :  { %v218_v38 = vpop.f32.mrf.mxu0 }
  0xf7   :  { %v219_v44 = vadd.f32 %v218_v38, %v1318_v0  ;;  %496 = vmatprep.mubr.bf16.mxu1 %v308_v32  ;;  %v282_v54 = vmax.f32 %v217_v41, 0.0 }
  0xf8   :  { %v220_v50 = vpop.f32.mrf.mxu0  ;;  %497 = vmatmul.mubr.bf16.gmra.mxu1 %v307_v35 }
  0xf9   :  { %v221_v51 = vadd.f32 %v220_v50, %v1316_v63  ;;  %v283_v52 = vmax.f32 %v219_v44, 0.0 }
  0xfa   :  { %v224_v53 = vpop.f32.mrf.mxu0 }
  0xfb   :  { %v284_v55 = vmax.f32 %v221_v51, 0.0  ;;  %v309_v59 = vpack.c.bf16 %v283_v52, %v281_v56  ;;  %v225_v1 = vadd.f32 %v224_v53, %v1318_v0 }
  0xfc   :  { %v226_v57 = vpop.f32.mrf.mxu0 }
  0xfd   :  { %v310_v58 = vpack.c.bf16 %v284_v55, %v282_v54  ;;  %v227_v61 = vadd.f32 %v226_v57, %v1316_v63  ;;  %v285_v8 = vmax.f32 %v225_v1, 0.0 }
  0xfe   :  { %v228_v60 = vpop.f32.mrf.mxu0 }
  0xff   :  { %v229_v62 = vadd.f32 %v228_v60, %v1318_v0  ;;  %504 = vmatprep.mubr.bf16.mxu1 %v310_v58  ;;  %v286_v6 = vmax.f32 %v227_v61, 0.0 }
 0x100   :  { %v230_v2 = vpop.f32.mrf.mxu0  ;;  %505 = vmatmul.mubr.bf16.gmra.mxu1 %v309_v59 }
 0x101   :  { %v231_v3 = vadd.f32 %v230_v2, %v1316_v63  ;;  %v287_v4 = vmax.f32 %v229_v62, 0.0 }
 0x102   :  { %v234_v5 = vpop.f32.mrf.mxu0 }
 0x103   :  { %v288_v7 = vmax.f32 %v231_v3, 0.0  ;;  %v311_v11 = vpack.c.bf16 %v287_v4, %v285_v8  ;;  %v235_v15 = vadd.f32 %v234_v5, %v1318_v0 }
 0x104   :  { %v236_v9 = vpop.f32.mrf.mxu0 }
 0x105   :  { %v312_v10 = vpack.c.bf16 %v288_v7, %v286_v6  ;;  %v237_v13 = vadd.f32 %v236_v9, %v1316_v63  ;;  %v289_v22 = vmax.f32 %v235_v15, 0.0 }
 0x106   :  { %v238_v12 = vpop.f32.mrf.mxu0 }
 0x107   :  { %v239_v14 = vadd.f32 %v238_v12, %v1318_v0  ;;  %512 = vmatprep.mubr.bf16.mxu1 %v312_v10  ;;  %v290_v20 = vmax.f32 %v237_v13, 0.0 }
 0x108   :  { %v240_v16 = vpop.f32.mrf.mxu0  ;;  %513 = vmatmul.mubr.bf16.gmra.mxu1 %v311_v11 }
 0x109   :  { %v241_v17 = vadd.f32 %v240_v16, %v1316_v63  ;;  %v291_v18 = vmax.f32 %v239_v14, 0.0 }
 0x10a   :  { %v244_v19 = vpop.f32.mrf.mxu0 }
 0x10b   :  { %v292_v21 = vmax.f32 %v241_v17, 0.0  ;;  %v313_v27 = vpack.c.bf16 %v291_v18, %v289_v22  ;;  %v245_v35 = vadd.f32 %v244_v19, %v1318_v0 }
 0x10c   :  { %v246_v23 = vpop.f32.mrf.mxu0 }
 0x10d   :  { %v314_v26 = vpack.c.bf16 %v292_v21, %v290_v20  ;;  %v247_v29 = vadd.f32 %v246_v23, %v1316_v63  ;;  %v293_v52 = vmax.f32 %v245_v35, 0.0  ;;  %v1355_v21 = vld [vmem:[%s1604_s4] ss:$0 sm:$0xff] }
 0x10e   :  { %v248_v28 = vpop.f32.mrf.mxu0 }
 0x10f   :  { %v249_v32 = vadd.f32 %v248_v28, %v1318_v0  ;;  %520 = vmatprep.mubr.bf16.mxu1 %v314_v26  ;;  %v294_v50 = vmax.f32 %v247_v29, 0.0 }
 0x110   :  { %v250_v38 = vpop.f32.mrf.mxu0  ;;  %521 = vmatmul.mubr.bf16.gmra.mxu1 %v313_v27 }
 0x111   :  { %v251_v41 = vadd.f32 %v250_v38, %v1316_v63  ;;  %v295_v44 = vmax.f32 %v249_v32, 0.0 }
 0x112   :  { %v254_v47 = vpop.f32.mrf.mxu0 }
 0x113   :  { %v296_v51 = vmax.f32 %v251_v41, 0.0  ;;  %v315_v55 = vpack.c.bf16 %v295_v44, %v293_v52  ;;  %v255_v59 = vadd.f32 %v254_v47, %v1318_v0 }
 0x114   :  { %v256_v53 = vpop.f32.mrf.mxu0 }
 0x115   :  { %v316_v54 = vpack.c.bf16 %v296_v51, %v294_v50  ;;  %v257_v57 = vadd.f32 %v256_v53, %v1316_v63  ;;  %v297_v4 = vmax.f32 %v255_v59, 0.0 }
 0x116   :  { %v258_v56 = vpop.f32.mrf.mxu0 }
 0x117   :  { %v259_v58 = vadd.f32 %v258_v56, %v1318_v0  ;;  %528 = vmatprep.mubr.bf16.mxu1 %v316_v54  ;;  %v298_v2 = vmax.f32 %v257_v57, 0.0 }
 0x118   :  { %v260_v60 = vpop.f32.mrf.mxu0  ;;  %529 = vmatmul.mubr.bf16.gmra.mxu1 %v315_v55 }
 0x119   :  { %v261_v61 = vadd.f32 %v260_v60, %v1316_v63  ;;  %v299_v62 = vmax.f32 %v259_v58, 0.0 }
 0x11a   :  { %v264_v1 = vpop.f32.mrf.mxu0 }
 0x11b   :  { %v300_v3 = vmax.f32 %v261_v61, 0.0  ;;  %v317_v7 = vpack.c.bf16 %v299_v62, %v297_v4  ;;  %v265_v11 = vadd.f32 %v264_v1, %v1318_v0 }
 0x11c   :  { %v266_v5 = vpop.f32.mrf.mxu0 }
 0x11d   :  { %v318_v6 = vpack.c.bf16 %v300_v3, %v298_v2  ;;  %v267_v9 = vadd.f32 %v266_v5, %v1316_v63  ;;  %v301_v17 = vmax.f32 %v265_v11, 0.0 }
 0x11e   :  { %v268_v8 = vpop.f32.mrf.mxu0 }
 0x11f   :  { %v269_v10 = vadd.f32 %v268_v8, %v1318_v0  ;;  %536 = vmatprep.mubr.bf16.mxu1 %v318_v6  ;;  %v302_v15 = vmax.f32 %v267_v9, 0.0 }
 0x120   :  { %v270_v12 = vpop.f32.mrf.mxu0  ;;  %537 = vmatmul.mubr.bf16.gmra.mxu1 %v317_v7 }
 0x121   :  { %v271_v13 = vadd.f32 %v270_v12, %v1316_v63  ;;  %v303_v14 = vmax.f32 %v269_v10, 0.0 }
 0x123   :  { %v304_v16 = vmax.f32 %v271_v13, 0.0  ;;  %v319_v19 = vpack.c.bf16 %v303_v14, %v301_v17 }
 0x125   :  { %v320_v18 = vpack.c.bf16 %v304_v16, %v302_v15 }
 0x127   :  { %544 = vmatprep.mubr.bf16.mxu1 %v320_v18 }
 0x128   :  { %545 = vmatmul.mubr.bf16.gmra.mxu1 %v319_v19 }
 0x1b0   :  { %v923_v20 = vpop.f32.mrf.mxu1 }
 0x1b2   :  { %v924_v22 = vpop.f32.mrf.mxu1 }
 0x1b3   :  { %v925_v0 = vadd.f32 %v924_v22, %v923_v20 }
 0x1b4   :  { %v926_v23 = vpop.f32.mrf.mxu1 }
 0x1b5   :  { %v491_v26 = vadd.f32 %v925_v0, %v1355_v21 }
 0x1b6   :  { %v927_v63 = vpop.f32.mrf.mxu1 }
 0x1b7   :  { %v928_v27 = vadd.f32 %v927_v63, %v926_v23  ;;  %v1359_v28 = vadd.f32 %v491_v26, %v1186_v24 }
 0x1b8   :  { %v929_v29 = vpop.f32.mrf.mxu1 }
 0x1b9   :  { %v494_v32 = vadd.f32 %v928_v27, %v1355_v21  ;;  %569 = vadd.xlane.f32.xlu0 %v1359_v28  ;;  %v618_v41 = vmul.f32 %v1359_v28, %v1359_v28 }
 0x1ba   :  { %v930_v35 = vpop.f32.mrf.mxu1 }
 0x1bb   :  { %v931_v38 = vadd.f32 %v930_v35, %v929_v29  ;;  %v1366_v44 = vadd.f32 %v494_v32, %v1191_v25 }
 0x1bc   :  { %v932_v47 = vpop.f32.mrf.mxu1 }
 0x1bd   :  { %v499_v50 = vadd.f32 %v931_v38, %v1355_v21  ;;  %634 = vadd.xlane.f32.xlu0 %v618_v41  ;;  %v619_v24 = vmul.f32 %v1366_v44, %v1366_v44 }
 0x1be   :  { %v933_v51 = vpop.f32.mrf.mxu1 }
 0x1bf   :  { %v934_v52 = vadd.f32 %v933_v51, %v932_v47  ;;  %636 = vadd.xlane.f32.xlu1 %v619_v24  ;;  %v1372_v53 = vadd.f32 %v499_v50, %v1208_v30 }
 0x1c0   :  { %v935_v54 = vpop.f32.mrf.mxu1 }
 0x1c1   :  { %v502_v55 = vadd.f32 %v934_v52, %v1355_v21  ;;  %571 = vadd.xlane.f32.xlu0 %v1366_v44  ;;  %v620_v57 = vmul.f32 %v1372_v53, %v1372_v53 }
 0x1c2   :  { %v936_v25 = vpop.f32.mrf.mxu1 }
 0x1c3   :  { %v937_v56 = vadd.f32 %v936_v25, %v935_v54  ;;  %573 = vadd.xlane.f32.xlu1 %v1372_v53  ;;  %v1381_v60 = vadd.f32 %v502_v55, %v1213_v31 }
 0x1c4   :  { %v938_v58 = vpop.f32.mrf.mxu1 }
 0x1c5   :  { %v507_v59 = vadd.f32 %v937_v56, %v1355_v21  ;;  %638 = vadd.xlane.f32.xlu0 %v620_v57  ;;  %v621_v3 = vmul.f32 %v1381_v60, %v1381_v60 }
 0x1c6   :  { %v939_v30 = vpop.f32.mrf.mxu1 }
 0x1c7   :  { %v940_v61 = vadd.f32 %v939_v30, %v938_v58  ;;  %575 = vadd.xlane.f32.xlu1 %v1381_v60  ;;  %v1385_v62 = vadd.f32 %v507_v59, %v1221_v33 }
 0x1c8   :  { %v941_v1 = vpop.f32.mrf.mxu1 }
 0x1c9   :  { %v510_v2 = vadd.f32 %v940_v61, %v1355_v21  ;;  %577 = vadd.xlane.f32.xlu0 %v1385_v62  ;;  %v622_v31 = vmul.f32 %v1385_v62, %v1385_v62 }
 0x1ca   :  { %v942_v4 = vpop.f32.mrf.mxu1 }
 0x1cb   :  { %v943_v5 = vadd.f32 %v942_v4, %v941_v1  ;;  %640 = vadd.xlane.f32.xlu1 %v621_v3  ;;  %v1395_v33 = vadd.f32 %v510_v2, %v1226_v34 }
 0x1cc   :  { %v944_v6 = vpop.f32.mrf.mxu1 }
 0x1cd   :  { %v515_v7 = vadd.f32 %v943_v5, %v1355_v21  ;;  %642 = vadd.xlane.f32.xlu0 %v622_v31  ;;  %v623_v13 = vmul.f32 %v1395_v33, %v1395_v33 }
 0x1ce   :  { %v945_v8 = vpop.f32.mrf.mxu1 }
 0x1cf   :  { %v946_v9 = vadd.f32 %v945_v8, %v944_v6  ;;  %579 = vadd.xlane.f32.xlu1 %v1395_v33  ;;  %v1399_v10 = vadd.f32 %v515_v7, %v1234_v36 }
 0x1d0   :  { %v947_v11 = vpop.f32.mrf.mxu1 }
 0x1d1   :  { %v518_v12 = vadd.f32 %v946_v9, %v1355_v21  ;;  %581 = vadd.xlane.f32.xlu0 %v1399_v10  ;;  %v624_v34 = vmul.f32 %v1399_v10, %v1399_v10 }
 0x1d2   :  { %v948_v14 = vpop.f32.mrf.mxu1 }
 0x1d3   :  { %v949_v15 = vadd.f32 %v948_v14, %v947_v11  ;;  %644 = vadd.xlane.f32.xlu1 %v623_v13  ;;  %v1409_v36 = vadd.f32 %v518_v12, %v1239_v37 }
 0x1d4   :  { %v950_v16 = vpop.f32.mrf.mxu1 }
 0x1d5   :  { %v523_v17 = vadd.f32 %v949_v15, %v1355_v21  ;;  %646 = vadd.xlane.f32.xlu0 %v624_v34  ;;  %v625_v23 = vmul.f32 %v1409_v36, %v1409_v36 }
 0x1d6   :  { %v951_v18 = vpop.f32.mrf.mxu1 }
 0x1d7   :  { %v952_v19 = vadd.f32 %v951_v18, %v950_v16  ;;  %583 = vadd.xlane.f32.xlu1 %v1409_v36  ;;  %v1413_v20 = vadd.f32 %v523_v17, %v1247_v39 }
 0x1d8   :  { %v953_v22 = vpop.f32.mrf.mxu1 }
 0x1d9   :  { %v526_v0 = vadd.f32 %v952_v19, %v1355_v21  ;;  %585 = vadd.xlane.f32.xlu0 %v1413_v20  ;;  %v626_v37 = vmul.f32 %v1413_v20, %v1413_v20 }
 0x1da   :  { %v954_v26 = vpop.f32.mrf.mxu1 }
 0x1db   :  { %v955_v63 = vadd.f32 %v954_v26, %v953_v22  ;;  %648 = vadd.xlane.f32.xlu1 %v625_v23  ;;  %v1423_v39 = vadd.f32 %v526_v0, %v1252_v40 }
 0x1dc   :  { %v956_v27 = vpop.f32.mrf.mxu1 }
 0x1dd   :  { %v531_v29 = vadd.f32 %v955_v63, %v1355_v21  ;;  %650 = vadd.xlane.f32.xlu0 %v626_v37  ;;  %v627_v50 = vmul.f32 %v1423_v39, %v1423_v39 }
 0x1de   :  { %v957_v32 = vpop.f32.mrf.mxu1 }
 0x1df   :  { %v958_v35 = vadd.f32 %v957_v32, %v956_v27  ;;  %587 = vadd.xlane.f32.xlu1 %v1423_v39  ;;  %v1427_v38 = vadd.f32 %v531_v29, %v1260_v42 }
 0x1e0   :  { %v959_v41 = vpop.f32.mrf.mxu1 }
 0x1e1   :  { %v534_v47 = vadd.f32 %v958_v35, %v1355_v21  ;;  %589 = vadd.xlane.f32.xlu0 %v1427_v38  ;;  %v628_v40 = vmul.f32 %v1427_v38, %v1427_v38 }
 0x1e2   :  { %v960_v24 = vpop.f32.mrf.mxu1 }
 0x1e3   :  { %v961_v51 = vadd.f32 %v960_v24, %v959_v41  ;;  %652 = vadd.xlane.f32.xlu1 %v627_v50  ;;  %v1437_v42 = vadd.f32 %v534_v47, %v1265_v43 }
 0x1e4   :  { %v962_v52 = vpop.f32.mrf.mxu1 }
 0x1e5   :  { %v539_v54 = vadd.f32 %v961_v51, %v1355_v21  ;;  %654 = vadd.xlane.f32.xlu0 %v628_v40  ;;  %v629_v59 = vmul.f32 %v1437_v42, %v1437_v42 }
 0x1e6   :  { %v963_v55 = vpop.f32.mrf.mxu1 }
 0x1e7   :  { %v964_v25 = vadd.f32 %v963_v55, %v962_v52  ;;  %591 = vadd.xlane.f32.xlu1 %v1437_v42  ;;  %v1441_v56 = vadd.f32 %v539_v54, %v1273_v45 }
 0x1e8   :  { %v965_v57 = vpop.f32.mrf.mxu1 }
 0x1e9   :  { %v542_v58 = vadd.f32 %v964_v25, %v1355_v21  ;;  %593 = vadd.xlane.f32.xlu0 %v1441_v56  ;;  %v630_v43 = vmul.f32 %v1441_v56, %v1441_v56 }
 0x1ea   :  { %v966_v30 = vpop.f32.mrf.mxu1 }
 0x1eb   :  { %v967_v61 = vadd.f32 %v966_v30, %v965_v57  ;;  %656 = vadd.xlane.f32.xlu1 %v629_v59  ;;  %v1451_v45 = vadd.f32 %v542_v58, %v1278_v46 }
 0x1ec   :  { %v968_v1 = vpop.f32.mrf.mxu1 }
 0x1ed   :  { %v547_v2 = vadd.f32 %v967_v61, %v1355_v21  ;;  %658 = vadd.xlane.f32.xlu0 %v630_v43  ;;  %v631_v6 = vmul.f32 %v1451_v45, %v1451_v45 }
 0x1ee   :  { %v969_v3 = vpop.f32.mrf.mxu1 }
 0x1ef   :  { %v970_v4 = vadd.f32 %v969_v3, %v968_v1  ;;  %595 = vadd.xlane.f32.xlu1 %v1451_v45  ;;  %v1455_v5 = vadd.f32 %v547_v2, %v1286_v48 }
 0x1f1   :  { %v550_v31 = vadd.f32 %v970_v4, %v1355_v21  ;;  %597 = vadd.xlane.f32.xlu0 %v1455_v5  ;;  %v632_v7 = vmul.f32 %v1455_v5, %v1455_v5 }
 0x1f3   :  { %660 = vadd.xlane.f32.xlu1 %v631_v6  ;;  %v1464_v46 = vadd.f32 %v550_v31, %v1291_v49  ;;  %v1491_v31 = vld [vmem:[%s1605_s5] ss:$0 sm:$0xff]  ;;  %s1070_s5 = smov [#allocation2]  }
 0x1f5   :  { %662 = vadd.xlane.f32.xlu0 %v632_v7  ;;  %v633_v48 = vmul.f32 %v1464_v46, %v1464_v46 }
 0x1f7   :  { %599 = vadd.xlane.f32.xlu1 %v1464_v46 }
 0x1fb   :  { %664 = vadd.xlane.f32.xlu1 %v633_v48 }
 0x242   :  { %v570_v21 = vpop.xlane.xlu0 %569 }
 0x243   :  { %v602_v8 = vmul.f32 0.0078125, %v570_v21 }
 0x245   :  { %v682_v11 = vmul.f32 %v602_v8, %v602_v8  ;;  %v730_v1 = vsub.f32 %v1359_v28, %v602_v8  ;;  %v1500_v28 = vld [vmem:[%s1606_s6] ss:$0 sm:$0xff]  ;;  %s861_s6 = sshll.u32 %s1070_s5, 4  ;;  %s862_s6 = int_to_ptr.vmem [resolvable:$true] %s861_s6 }
 0x246   :  { %v635_v9 = vpop.xlane.xlu0 %634  ;;  %s1047_s30 = scalar_lea.vmem %s862_s6, 2048  ;;  %p1052_p1 = scmp.lt.s32.totalorder %s862_s6, %s862_s6 }
 0x247   :  { %v666_v12 = vmul.f32 0.0078125, %v635_v9  ;;  %p1048_p0 = scmp.ne.s32.totalorder %s862_s6, %s1047_s30  ;;  %p1053_p2 = scmp.lt.s32.totalorder %s1047_s30, %s1047_s30 }
 0x248   :  { %v637_v13 = vpop.xlane.xlu1 %636 }
 0x249   :  { %v698_v14 = vsub.f32 %v666_v12, %v682_v11  ;;  %v667_v18 = vmul.f32 0.0078125, %v637_v13  ;;  %p1054_p3 = por %p1053_p2, %p1052_p1 }
 0x24a   :  { %v572_v15 = vpop.xlane.xlu0 %571 }
 0x24b   :  { %v714_v34 = vmax.f32 %v698_v14, 0.0  ;;  %v1469_v16 = vmul.f32 0.0078125, %v572_v15  ;;  %p1055_p4 = pnand %p1054_p3, %p1048_p0 }
 0x24c   :  { %v574_v17 = vpop.xlane.xlu1 %573 }
 0x24d   :  { %v746_v49 = vadd.f32 1e-05, %v714_v34  ;;  %v683_v19 = vmul.f32 %v1469_v16, %v1469_v16  ;;  %v1473_v22 = vmul.f32 0.0078125, %v574_v17  ;;  %v731_v34 = vsub.f32 %v1366_v44, %v1469_v16 }
 0x24e   :  { %v639_v0 = vpop.xlane.xlu0 %638 }
 0x24f   :  { %1015 = vrsqrt.f32 %v746_v49  ;;  %v699_v23 = vsub.f32 %v667_v18, %v683_v19  ;;  %v684_v26 = vmul.f32 %v1473_v22, %v1473_v22  ;;  %v668_v63 = vmul.f32 0.0078125, %v639_v0 }
 0x250   :  { %v576_v37 = vpop.xlane.xlu1 %575 }
 0x251   :  { %v715_v27 = vmax.f32 %v699_v23, 0.0  ;;  %v1477_v29 = vmul.f32 0.0078125, %v576_v37  ;;  %v700_v32 = vsub.f32 %v668_v63, %v684_v26 }
 0x252   :  { %v578_v35 = vpop.xlane.xlu0 %577 }
 0x253   :  { %v747_v41 = vadd.f32 1e-05, %v715_v27  ;;  %v1479_v47 = vmul.f32 0.0078125, %v578_v35  ;;  %v716_v50 = vmax.f32 %v700_v32, 0.0  ;;  %v685_v51 = vmul.f32 %v1477_v29, %v1477_v29 }
 0x254   :  { %v641_v24 = vpop.xlane.xlu1 %640  ;;  %v732_v32 = vsub.f32 %v1372_v53, %v1473_v22 }
 0x255   :  { %1017 = vrsqrt.f32 %v747_v41  ;;  %v669_v40 = vmul.f32 0.0078125, %v641_v24  ;;  %v748_v52 = vadd.f32 1e-05, %v716_v50  ;;  %v686_v55 = vmul.f32 %v1479_v47, %v1479_v47 }
 0x256   :  { %v643_v54 = vpop.xlane.xlu0 %642 }
 0x257   :  { %v701_v25 = vsub.f32 %v669_v40, %v685_v51  ;;  %v670_v57 = vmul.f32 0.0078125, %v643_v54  ;;  %1019 = vrsqrt.f32 %v748_v52 }
 0x258   :  { %v580_v58 = vpop.xlane.xlu1 %579 }
 0x259   :  { %v717_v59 = vmax.f32 %v701_v25, 0.0  ;;  %v702_v30 = vsub.f32 %v670_v57, %v686_v55  ;;  %v1485_v61 = vmul.f32 0.0078125, %v580_v58  ;;  %v733_v58 = vsub.f32 %v1381_v60, %v1477_v29 }
 0x25a   :  { %v582_v43 = vpop.xlane.xlu0 %581 }
 0x25b   :  { %v749_v2 = vadd.f32 1e-05, %v717_v59  ;;  %v718_v3 = vmax.f32 %v702_v30, 0.0  ;;  %v687_v6 = vmul.f32 %v1485_v61, %v1485_v61  ;;  %v1495_v7 = vmul.f32 0.0078125, %v582_v43 }
 0x25c   :  { %v1016_v4 = vpop.eup %1015  ;;  %v645_v48 = vpop.xlane.xlu1 %644 }
 0x25d   :  { %v778_v21 = vmul.f32 %v1016_v4, %v730_v1  ;;  %1021 = vrsqrt.f32 %v749_v2  ;;  %v750_v9 = vadd.f32 1e-05, %v718_v3  ;;  %v671_v11 = vmul.f32 0.0078125, %v645_v48 }
 0x25e   :  { %v688_v8 = vmul.f32 %v1495_v7, %v1495_v7  ;;  %v647_v12 = vpop.xlane.xlu0 %646  ;;  %v734_v4 = vsub.f32 %v1385_v62, %v1479_v47 }
 0x25f   :  { %v801_v13 = vmul.f32 %v1491_v31, %v778_v21  ;;  %1023 = vrsqrt.f32 %v750_v9  ;;  %v703_v14 = vsub.f32 %v671_v11, %v687_v6  ;;  %v672_v15 = vmul.f32 0.0078125, %v647_v12 }
 0x260   :  { %v584_v17 = vpop.xlane.xlu1 %583 }
 0x261   :  { %v824_v49 = vadd.f32 %v1500_v28, %v801_v13  ;;  %v719_v18 = vmax.f32 %v703_v14, 0.0  ;;  %v704_v19 = vsub.f32 %v672_v15, %v688_v8  ;;  %v1508_v0 = vmul.f32 0.0078125, %v584_v17 }
 0x262   :  { %v1018_v23 = vpop.eup %1017  ;;  %v586_v26 = vpop.xlane.xlu0 %585 }
 0x263   :  { %840 = vst [vmem:[#allocation2] sm:$0xff] %v824_v49  ;;  %v779_v63 = vmul.f32 %v1018_v23, %v731_v34  ;;  %v751_v37 = vadd.f32 1e-05, %v719_v18  ;;  %v720_v27 = vmax.f32 %v704_v19, 0.0  ;;  %v689_v35 = vmul.f32 %v1508_v0, %v1508_v0 }
 0x264   :  { %v1514_v44 = vmul.f32 0.0078125, %v586_v26  ;;  %v649_v16 = vpop.xlane.xlu1 %648  ;;  %v1020_v41 = vpop.eup %1019  ;;  %v735_v23 = vsub.f32 %v1395_v33, %v1485_v61 }
 0x265   :  { %v802_v50 = vmul.f32 %v1491_v31, %v779_v63  ;;  %1025 = vrsqrt.f32 %v751_v37  ;;  %v752_v24 = vadd.f32 1e-05, %v720_v27  ;;  %v673_v51 = vmul.f32 0.0078125, %v649_v16 }
 0x266   :  { %v780_v40 = vmul.f32 %v1020_v41, %v732_v32  ;;  %v690_v52 = vmul.f32 %v1514_v44, %v1514_v44  ;;  %v651_v54 = vpop.xlane.xlu0 %650 }
 0x267   :  { %v825_v55 = vadd.f32 %v1500_v28, %v802_v50  ;;  %1027 = vrsqrt.f32 %v752_v24  ;;  %v705_v53 = vsub.f32 %v673_v51, %v689_v35  ;;  %v674_v22 = vmul.f32 0.0078125, %v651_v54 }
 0x268   :  { %v803_v25 = vmul.f32 %v1491_v31, %v780_v40  ;;  %v588_v57 = vpop.xlane.xlu1 %587  ;;  %v736_v35 = vsub.f32 %v1399_v10, %v1495_v7 }
 0x269   :  { %841 = vst [vmem:[#allocation2 + $0x8] sm:$0xff] %v825_v55  ;;  %v721_v59 = vmax.f32 %v705_v53, 0.0  ;;  %v706_v30 = vsub.f32 %v674_v22, %v690_v52  ;;  %v1524_v2 = vmul.f32 0.0078125, %v588_v57 }
 0x26a   :  { %v1022_v43 = vpop.eup %1021  ;;  %v826_v1 = vadd.f32 %v1500_v28, %v803_v25  ;;  %v590_v3 = vpop.xlane.xlu0 %589 }
 0x26b   :  { %v781_v6 = vmul.f32 %v1022_v43, %v733_v58  ;;  %v753_v48 = vadd.f32 1e-05, %v721_v59  ;;  %v722_v21 = vmax.f32 %v706_v30, 0.0  ;;  %v1528_v11 = vmul.f32 0.0078125, %v590_v3 }
 0x26c   :  { %v1024_v9 = vpop.eup %1023  ;;  %842 = vst [vmem:[#allocation2 + $0x10] sm:$0xff] %v826_v1  ;;  %v653_v8 = vpop.xlane.xlu1 %652  ;;  %v691_v13 = vmul.f32 %v1524_v2, %v1524_v2  ;;  %v737_v30 = vsub.f32 %v1409_v36, %v1508_v0 }
 0x26d   :  { %v804_v60 = vmul.f32 %v1491_v31, %v781_v6  ;;  %v782_v29 = vmul.f32 %v1024_v9, %v734_v4  ;;  %1029 = vrsqrt.f32 %v753_v48  ;;  %v754_v12 = vadd.f32 1e-05, %v722_v21 }
 0x26e   :  { %v692_v14 = vmul.f32 %v1528_v11, %v1528_v11  ;;  %v675_v62 = vmul.f32 0.0078125, %v653_v8  ;;  %v655_v47 = vpop.xlane.xlu0 %654  ;;  %v738_v48 = vsub.f32 %v1413_v20, %v1514_v44 }
 0x26f   :  { %v827_v15 = vadd.f32 %v1500_v28, %v804_v60  ;;  %v805_v34 = vmul.f32 %v1491_v31, %v782_v29  ;;  %1031 = vrsqrt.f32 %v754_v12  ;;  %v676_v17 = vmul.f32 0.0078125, %v655_v47 }
 0x270   :  { %v707_v49 = vsub.f32 %v675_v62, %v691_v13  ;;  %v592_v18 = vpop.xlane.xlu1 %591 }
 0x271   :  { %843 = vst [vmem:[#allocation2 + $0x18] sm:$0xff] %v827_v15  ;;  %v828_v19 = vadd.f32 %v1500_v28, %v805_v34  ;;  %v708_v26 = vsub.f32 %v676_v17, %v692_v14  ;;  %v1540_v63 = vmul.f32 0.0078125, %v592_v18 }
 0x272   :  { %v1026_v37 = vpop.eup %1025  ;;  %v723_v27 = vmax.f32 %v707_v49, 0.0  ;;  %v594_v32 = vpop.xlane.xlu0 %593 }
 0x273   :  { %844 = vst [vmem:[#allocation2 + $0x20] sm:$0xff] %v828_v19  ;;  %v783_v16 = vmul.f32 %v1026_v37, %v735_v23  ;;  %v724_v41 = vmax.f32 %v708_v26, 0.0  ;;  %v693_v51 = vmul.f32 %v1540_v63, %v1540_v63  ;;  %v1546_v40 = vmul.f32 0.0078125, %v594_v32 }
 0x274   :  { %v1028_v50 = vpop.eup %1027  ;;  %v755_v24 = vadd.f32 1e-05, %v723_v27  ;;  %v657_v33 = vpop.xlane.xlu1 %656  ;;  %v739_v37 = vsub.f32 %v1423_v39, %v1524_v2  ;;  %v740_v32 = vsub.f32 %v1427_v38, %v1528_v11  ;;  %v741_v11 = vsub.f32 %v1437_v42, %v1540_v63 }
 0x275   :  { %v806_v61 = vmul.f32 %v1491_v31, %v783_v16  ;;  %v784_v52 = vmul.f32 %v1028_v50, %v736_v35  ;;  %v756_v54 = vadd.f32 1e-05, %v724_v41  ;;  %v677_v55 = vmul.f32 0.0078125, %v657_v33 }
 0x276   :  { %1033 = vrsqrt.f32 %v755_v24  ;;  %v659_v53 = vpop.xlane.xlu0 %658  ;;  %v694_v25 = vmul.f32 %v1546_v40, %v1546_v40 }
 0x277   :  { %v829_v22 = vadd.f32 %v1500_v28, %v806_v61  ;;  %v807_v10 = vmul.f32 %v1491_v31, %v784_v52  ;;  %1035 = vrsqrt.f32 %v756_v54  ;;  %v709_v7 = vsub.f32 %v677_v55, %v693_v51 }
 0x278   :  { %v678_v57 = vmul.f32 0.0078125, %v659_v53  ;;  %v596_v58 = vpop.xlane.xlu1 %595 }
 0x279   :  { %845 = vst [vmem:[#allocation2 + $0x28] sm:$0xff] %v829_v22  ;;  %v830_v59 = vadd.f32 %v1500_v28, %v807_v10  ;;  %v725_v43 = vmax.f32 %v709_v7, 0.0  ;;  %v1556_v1 = vmul.f32 0.0078125, %v596_v58 }
 0x27a   :  { %v1030_v3 = vpop.eup %1029  ;;  %v710_v4 = vsub.f32 %v678_v57, %v694_v25  ;;  %v598_v6 = vpop.xlane.xlu0 %597  ;;  %v742_v25 = vsub.f32 %v1441_v56, %v1546_v40 }
 0x27b   :  { %846 = vst [vmem:[#allocation2 + $0x30] sm:$0xff] %v830_v59  ;;  %v785_v21 = vmul.f32 %v1030_v3, %v737_v30  ;;  %v757_v9 = vadd.f32 1e-05, %v725_v43  ;;  %v695_v29 = vmul.f32 %v1556_v1, %v1556_v1  ;;  %v1562_v12 = vmul.f32 0.0078125, %v598_v6 }
 0x27c   :  { %v1032_v8 = vpop.eup %1031  ;;  %v726_v60 = vmax.f32 %v710_v4, 0.0  ;;  %v661_v36 = vpop.xlane.xlu1 %660  ;;  %v743_v42 = vsub.f32 %v1451_v45, %v1556_v1 }
 0x27d   :  { %v808_v0 = vmul.f32 %v1491_v31, %v785_v21  ;;  %v786_v13 = vmul.f32 %v1032_v8, %v738_v48  ;;  %1037 = vrsqrt.f32 %v757_v9  ;;  %v679_v14 = vmul.f32 0.0078125, %v661_v36 }
 0x27e   :  { %v758_v62 = vadd.f32 1e-05, %v726_v60  ;;  %v696_v47 = vmul.f32 %v1562_v12, %v1562_v12  ;;  %v663_v20 = vpop.xlane.xlu0 %662  ;;  %v744_v4 = vsub.f32 %v1455_v5, %v1562_v12 }
 0x27f   :  { %v831_v44 = vadd.f32 %v1500_v28, %v808_v0  ;;  %v809_v15 = vmul.f32 %v1491_v31, %v786_v13  ;;  %v711_v34 = vsub.f32 %v679_v14, %v695_v29  ;;  %v680_v17 = vmul.f32 0.0078125, %v663_v20 }
 0x280   :  { %1039 = vrsqrt.f32 %v758_v62  ;;  %v600_v49 = vpop.xlane.xlu1 %599 }
 0x281   :  { %847 = vst [vmem:[#allocation2 + $0x38] sm:$0xff] %v831_v44  ;;  %v832_v18 = vadd.f32 %v1500_v28, %v809_v15  ;;  %v727_v19 = vmax.f32 %v711_v34, 0.0  ;;  %v712_v23 = vsub.f32 %v680_v17, %v696_v47  ;;  %v617_v26 = vmul.f32 0.0078125, %v600_v49 }
 0x283   :  { %v1034_v27 = vpop.eup %1033  ;;  %848 = vst [vmem:[#allocation2 + $0x40] sm:$0xff] %v832_v18  ;;  %v759_v35 = vadd.f32 1e-05, %v727_v19  ;;  %v728_v16 = vmax.f32 %v712_v23, 0.0  ;;  %v697_v24 = vmul.f32 %v617_v26, %v617_v26  ;;  %v745_v45 = vsub.f32 %v1464_v46, %v617_v26 }
 0x284   :  { %v1036_v41 = vpop.eup %1035  ;;  %v787_v50 = vmul.f32 %v1034_v27, %v739_v37  ;;  %v665_v51 = vpop.xlane.xlu1 %664 }
 0x285   :  { %v788_v33 = vmul.f32 %v1036_v41, %v740_v32  ;;  %1041 = vrsqrt.f32 %v759_v35  ;;  %v760_v61 = vadd.f32 1e-05, %v728_v16  ;;  %v681_v52 = vmul.f32 0.0078125, %v665_v51 }
 0x286   :  { %v810_v54 = vmul.f32 %v1491_v31, %v787_v50 }
 0x287   :  { %v811_v55 = vmul.f32 %v1491_v31, %v788_v33  ;;  %1043 = vrsqrt.f32 %v760_v61  ;;  %v713_v39 = vsub.f32 %v681_v52, %v697_v24 }
 0x288   :  { %v833_v2 = vadd.f32 %v1500_v28, %v810_v54 }
 0x289   :  { %v834_v38 = vadd.f32 %v1500_v28, %v811_v55  ;;  %v729_v53 = vmax.f32 %v713_v39, 0.0 }
 0x28a   :  { %v1038_v22 = vpop.eup %1037  ;;  %849 = vst [vmem:[#allocation2 + $0x48] sm:$0xff] %v833_v2 }
 0x28b   :  { %850 = vst [vmem:[#allocation2 + $0x50] sm:$0xff] %v834_v38  ;;  %v789_v10 = vmul.f32 %v1038_v22, %v741_v11  ;;  %v761_v7 = vadd.f32 1e-05, %v729_v53 }
 0x28d   :  { %v1040_v57 = vpop.eup %1039  ;;  %v812_v58 = vmul.f32 %v1491_v31, %v789_v10  ;;  %1045 = vrsqrt.f32 %v761_v7 }
 0x28e   :  { %v790_v59 = vmul.f32 %v1040_v57, %v742_v25 }
 0x28f   :  { %v835_v30 = vadd.f32 %v1500_v28, %v812_v58 }
 0x290   :  { %v813_v43 = vmul.f32 %v1491_v31, %v790_v59 }
 0x291   :  { %851 = vst [vmem:[#allocation2 + $0x58] sm:$0xff] %v835_v30 }
 0x292   :  { %v1042_v63 = vpop.eup %1041  ;;  %v836_v3 = vadd.f32 %v1500_v28, %v813_v43 }
 0x293   :  { %v791_v56 = vmul.f32 %v1042_v63, %v743_v42 }
 0x294   :  { %v1044_v40 = vpop.eup %1043  ;;  %852 = vst [vmem:[#allocation2 + $0x60] sm:$0xff] %v836_v3 }
 0x295   :  { %v814_v6 = vmul.f32 %v1491_v31, %v791_v56  ;;  %v792_v48 = vmul.f32 %v1044_v40, %v744_v4 }
 0x297   :  { %v837_v21 = vadd.f32 %v1500_v28, %v814_v6  ;;  %v815_v9 = vmul.f32 %v1491_v31, %v792_v48 }
 0x299   :  { %853 = vst [vmem:[#allocation2 + $0x68] sm:$0xff] %v837_v21  ;;  %v838_v8 = vadd.f32 %v1500_v28, %v815_v9 }
 0x29a   :  { %v1046_v1 = vpop.eup %1045 }
 0x29b   :  { %854 = vst [vmem:[#allocation2 + $0x70] sm:$0xff] %v838_v8  ;;  %v793_v60 = vmul.f32 %v1046_v1, %v745_v45 }
 0x29d   :  { %v816_v5 = vmul.f32 %v1491_v31, %v793_v60 }
 0x29f   :  { %v839_v29 = vadd.f32 %v1500_v28, %v816_v5 }
 0x2a1   :  { %855 = vst [vmem:[#allocation2 + $0x78] sm:$0xff] %v839_v29 }
 0x2a2   :  { %1058 = shalt.err (!%p1055_p4)
}
 0x2a3   :  { %s1071_s8 = smov 128   ;;  %s1072_s1 = smov 8  }
 0x2a4   :  { %867 = dma.vmem_to_hbm [thread:$0]  %s862_s6, 2048, %s1607_s7, [#allocation3], %s1071_s8, %s1071_s8, %s1072_s1  }
 0x2a5   :  { %1067 = dma.done.wait [#allocation3], 2048  }
 0x2a6   :  { %1068 = vsyncadd [#allocation3], 4294965248 }
 0x2a7   :  { %871 = vsyncpa [#allocation3], 1 }

</bundles_post_ra>
